<compile_context>
chip_gen: v6e
topology: v6e:2x2x1
jax: 0.10.0
libtpu: 0.0.40
codegen_flags: <defaults>
</compile_context>

<pallas_src>
import jax
import jax.numpy as jnp
import numpy as np
from jax import lax
from jax.experimental import pallas as pl
from jax.experimental.pallas import tpu as pltpu

WARMUP = 80          # self.warmpup in the torch module
EPS_FINAL = 0.01     # epsilon subtracted from key_loss before clamping at 0
EPS_LOGV = 0.0       # epsilon inside loss_value (still 0.0 at that point)

# Default tile sizes — largest blocks that keep 2 inputs x 2 pipeline buffers well
# under the default scoped-VMEM limit on every generation (f32 loss worst case:
# 512*1024*(4+1) B * 2 buffers ≈ 5 MiB). Raise per-generation if desired.
MAX_TR = 512         # rows (c,l pairs) per tile — sublane axis
MAX_TN = 1024        # samples per tile          — lane axis


def _round_up(x, m):
    return ((x + m - 1) // m) * m


def _sample_loss_kernel(step_ref, loss_ref, succ_ref, rowloss_ref, tot_acc, true_acc):
    # step_ref    : SMEM (1,)     int32  — self.iter_step (scalar prefetch)
    # loss_ref    : VMEM (TR, TN) bf16/f32 — lossTensor chunk
    # succ_ref    : VMEM (TR, TN) int8     — lcSuccesses chunk in {0, 1}
    # rowloss_ref : VMEM (TR, 1)  f32      — per-(c,l) loss_ (written at last chunk)
    # tot_acc / true_acc : VMEM (TR, 1) f32 scratch accumulators
    k = pl.program_id(1)

    @pl.when(k == 0)
    def _():
        tot_acc[...] = jnp.zeros_like(tot_acc)
        true_acc[...] = jnp.zeros_like(true_acc)

    # Up-cast on load; all VPU math/accumulation in f32 (no bf16 ALU on v5e).
    loss = loss_ref[...].astype(jnp.float32)               # (TR, TN)
    succ = succ_ref[...].astype(jnp.float32)               # int8 {0,1} -> f32
    masked = jnp.where(succ == 1.0, loss, 0.0)             # lossTensor[lcSuccesses == 1]

    tot_acc[...] += jnp.sum(loss, axis=-1, keepdims=True)      # lossTensor.sum()
    true_acc[...] += jnp.sum(masked, axis=-1, keepdims=True)   # true_val.sum()

    @pl.when(k == pl.num_programs(1) - 1)
    def _():
        tot = tot_acc[...]
        tru = true_acc[...]
        # guards: `if lossTensor.sum() != 0` and `if true_val.sum() != 0`
        valid = jnp.logical_and(tot != 0.0, tru != 0.0)
        safe_tot = jnp.where(tot != 0.0, tot, 1.0)
        ratio = jnp.where(valid, tru / safe_tot, 1.0)          # log(1)=0 on skipped rows
        loss_value = EPS_LOGV + jnp.log(ratio)                 # epsilon - -1*log(ratio)
        is_warmup = step_ref[0] < WARMUP
        # warmup: min_val = detach(loss_value); afterwards min_val = -1
        min_val = jnp.where(is_warmup, lax.stop_gradient(loss_value), -1.0)
        rowloss_ref[...] = jnp.where(valid, min_val * loss_value, 0.0)


def sample_loss_forward(loss_tensors, lc_successes, iter_step, *,
                        max_tr=MAX_TR, max_tn=MAX_TN):
    """loss_tensors: (C, L, N) bf16/f32; lc_successes: (C, L, N) int8/bool in {0,1}.
    Returns (lmbd_loss scalar, key_losses per constraint of shape (C,))."""
    C, L, N = loss_tensors.shape
    R = C * L

    # Dense 2-D layout (free reshape for contiguous arrays) — no dtype casts here.
    loss2d = loss_tensors.reshape(R, N)
    succ2d = lc_successes.reshape(R, N)

    # Tile selection: sublane rounded to 32 (int8-native tiling), lanes to 128.
    TR = min(max_tr, _round_up(R, 32))
    TN = min(max_tn, _round_up(N, 128))
    Rp = _round_up(R, TR)
    Np = _round_up(N, TN)
    if Rp != R or Np != N:   # zero padding is neutral for the masked sums
        loss2d = jnp.pad(loss2d, ((0, Rp - R), (0, Np - N)))
        succ2d = jnp.pad(succ2d, ((0, Rp - R), (0, Np - N)))

    grid = (Rp // TR, Np // TN)
    step = jnp.asarray([iter_step], dtype=jnp.int32)
    elem_bytes = loss2d.dtype.itemsize + succ2d.dtype.itemsize

    row_losses = pl.pallas_call(
        _sample_loss_kernel,
        out_shape=jax.ShapeDtypeStruct((Rp, 1), jnp.float32),
        grid_spec=pltpu.PrefetchScalarGridSpec(
            num_scalar_prefetch=1,
            grid=grid,
            in_specs=[pl.BlockSpec((TR, TN), lambda r, k, step: (r, k)),
                      pl.BlockSpec((TR, TN), lambda r, k, step: (r, k))],
            out_specs=pl.BlockSpec((TR, 1), lambda r, k, step: (r, 0)),
            scratch_shapes=[pltpu.VMEM((TR, 1), jnp.float32),
                            pltpu.VMEM((TR, 1), jnp.float32)]),
        compiler_params=pltpu.CompilerParams(
            dimension_semantics=("parallel", "arbitrary")),
        cost_estimate=pl.CostEstimate(
            flops=3 * Rp * Np,            # mask-select + two adds per element
            transcendentals=Rp,           # one log per (c,l) row
            bytes_accessed=Rp * Np * elem_bytes + Rp * 4),
    )(step, loss2d, succ2d)

    # Tiny host-side finalize (fused by XLA): fold L, clamp, total.
    per_row = row_losses[:R, 0].reshape(C, L)                        # loss_ per (c,l)
    key_losses = jnp.maximum(jnp.sum(per_row, axis=-1) - EPS_FINAL, 0.0)
    lmbd_loss = jnp.sum(key_losses)
    return lmbd_loss, key_losses


def _reference(loss_tensors, lc_successes, iter_step):
    """Pure-numpy mirror of the torch forward (sampleSize != -1 path)."""
    lt = np.asarray(loss_tensors).astype(np.float64)
    sc = np.asarray(lc_successes).astype(np.float64)
    C, L, _ = lt.shape
    key_losses = np.zeros((C,), dtype=np.float64)
    for c in range(C):
        kl = 0.0
        for l in range(L):
            tot = lt[c, l].sum()
            if tot == 0.0:
                continue
            tsum = (lt[c, l] * (sc[c, l] == 1.0)).sum()
            if tsum == 0.0:
                continue
            loss_value = EPS_LOGV + np.log(tsum / tot)
            min_val = loss_value if iter_step < WARMUP else -1.0
            kl += min_val * loss_value
        key_losses[c] = max(kl - EPS_FINAL, 0.0)
    return key_losses.sum(), key_losses


# TODO(synk): sampleSize == -1 branch (torch.unique / np.intersect1d over sampleInfo)
#             is data-dependent dedup with no clean Pallas equivalent; not implemented.
# TODO(synk): constr_loss['globalSuccessCounter'] > 0 override (swap lcSuccesses for
#             globalSuccesses) is upstream-builder state; caller passes the final mask.
# TODO(synk): DataNodeBuilder / MacroAverageTracker bookkeeping is host-side, not kernel compute.

if __name__ == "__main__":
    C, L, N = 4, 2, 512   # 4 logical constraints, 2 lossTensors each, 512 samples
    key = jax.random.PRNGKey(0)
    k1, k2 = jax.random.split(key)
    # Narrow input dtypes straight into the kernel: bf16 loss, int8 {0,1} mask.
    loss_tensors = jax.random.uniform(k1, (C, L, N), dtype=jnp.float32).astype(jnp.bfloat16)
    lc_successes = (jax.random.uniform(k2, (C, L, N)) > 0.5).astype(jnp.int8)

    # Exercise both skip guards: one all-zero success slice, one all-zero lossTensor slice.
    lc_successes = lc_successes.at[1, 0].set(0)
    loss_tensors = loss_tensors.at[2, 1].set(0)

    # Module parameter: self.lmbd = nn.Parameter(zeros(nconstr)); unused in forward loss.
    lmbd = jnp.zeros((C,), dtype=jnp.float32)

    # (iter_step=1, tiny tiles) -> warmup branch + multi-chunk accumulation path;
    # (iter_step=100, default tiles) -> post-warmup branch + single-block path.
    for iter_step, tiles in ((1, dict(max_tr=32, max_tn=128)), (100, {})):
        lmbd_loss, key_losses = sample_loss_forward(loss_tensors, lc_successes,
                                                    iter_step, **tiles)
        lmbd_loss = jax.block_until_ready(lmbd_loss)
        key_losses = jax.block_until_ready(key_losses)

        ref_total, ref_keys = _reference(loss_tensors, lc_successes, iter_step)
        np.testing.assert_allclose(np.asarray(key_losses, dtype=np.float64), ref_keys,
                                   rtol=1e-4, atol=1e-5)
        np.testing.assert_allclose(float(lmbd_loss), ref_total, rtol=1e-4, atol=1e-5)

    print("KERNEL_OK")
</pallas_src>

<mosaic_0001>
module attributes {stable_mosaic.version = 11 : i64} {
  func.func @_sample_loss_kernel(%arg0: i32, %arg1: i32, %arg2: memref<1xi32, #tpu.memory_space<smem>>, %arg3: memref<32x128xbf16, #tpu.memory_space<vmem>>, %arg4: memref<32x128xi8, #tpu.memory_space<vmem>>, %arg5: memref<32x1xf32, #tpu.memory_space<vmem>>, %arg6: memref<32x1xf32, #tpu.memory_space<vmem>>, %arg7: memref<32x1xf32, #tpu.memory_space<vmem>>) attributes {dimension_semantics = [#tpu.dimension_semantics<parallel>, #tpu.dimension_semantics<arbitrary>], iteration_bounds = array<i64: 1, 4>, scalar_prefetch = 1 : i64, scratch_operands = 2 : i64, tpu.core_type = #tpu.core_type<tc>, window_params = [{transform_indices = @transform_0, window_bounds = array<i64: 32, 128>}, {transform_indices = @transform_1, window_bounds = array<i64: 32, 128>}, {transform_indices = @transform_2, window_bounds = array<i64: 32, 1>}]} {
    %c0_i32 = arith.constant 0 : i32
    %0 = arith.cmpi eq, %arg1, %c0_i32 : i32
    %1 = arith.extui %0 : i1 to i32
    %c0_i32_0 = arith.constant 0 : i32
    %2 = arith.cmpi ne, %1, %c0_i32_0 : i32
    scf.if %2 {
      %cst_16 = arith.constant 0.000000e+00 : f32
      %24 = vector.broadcast %cst_16 : f32 to vector<32x1xf32>
      %c0_17 = arith.constant 0 : index
      %c0_18 = arith.constant 0 : index
      %25 = vector.load %arg6[%c0_17, %c0_18] : memref<32x1xf32, #tpu.memory_space<vmem>>, vector<32x1xf32>
      tpu.vector_store %arg6[%c0_17, %c0_18], %24 {strides = array<i32>} : memref<32x1xf32, #tpu.memory_space<vmem>>, vector<32x1xf32>,
      %cst_19 = arith.constant 0.000000e+00 : f32
      %26 = vector.broadcast %cst_19 : f32 to vector<32x1xf32>
      %c0_20 = arith.constant 0 : index
      %c0_21 = arith.constant 0 : index
      %27 = vector.load %arg7[%c0_20, %c0_21] : memref<32x1xf32, #tpu.memory_space<vmem>>, vector<32x1xf32>
      tpu.vector_store %arg7[%c0_20, %c0_21], %26 {strides = array<i32>} : memref<32x1xf32, #tpu.memory_space<vmem>>, vector<32x1xf32>,
    } else {
    }
    %c0 = arith.constant 0 : index
    %c0_1 = arith.constant 0 : index
    %3 = vector.load %arg3[%c0, %c0_1] : memref<32x128xbf16, #tpu.memory_space<vmem>>, vector<32x128xbf16>
    %4 = arith.extf %3 : vector<32x128xbf16> to vector<32x128xf32>
    %c0_2 = arith.constant 0 : index
    %c0_3 = arith.constant 0 : index
    %5 = vector.load %arg4[%c0_2, %c0_3] : memref<32x128xi8, #tpu.memory_space<vmem>>, vector<32x128xi8>
    %6 = arith.sitofp %5 : vector<32x128xi8> to vector<32x128xf32>
    %cst = arith.constant 1.000000e+00 : f32
    %7 = vector.broadcast %cst : f32 to vector<32x128xf32>
    %8 = arith.cmpf oeq, %6, %7 : vector<32x128xf32>
    %cst_4 = arith.constant 0.000000e+00 : f32
    %9 = vector.broadcast %cst_4 : f32 to vector<32x128xf32>
    %10 = arith.select %8, %4, %9 : vector<32x128xi1>, vector<32x128xf32>
    %c0_5 = arith.constant 0 : index
    %c0_6 = arith.constant 0 : index
    %11 = vector.load %arg6[%c0_5, %c0_6] : memref<32x1xf32, #tpu.memory_space<vmem>>, vector<32x1xf32>
    %cst_7 = arith.constant dense<0.000000e+00> : vector<32xf32>
    %12 = vector.multi_reduction <add>, %4, %cst_7 [1] : vector<32x128xf32> to vector<32xf32>
    %13 = vector.shape_cast %12 : vector<32xf32> to vector<32x1xf32>
    %14 = arith.addf %11, %13 : vector<32x1xf32>
    %c0_8 = arith.constant 0 : index
    %c0_9 = arith.constant 0 : index
    %15 = vector.load %arg6[%c0_8, %c0_9] : memref<32x1xf32, #tpu.memory_space<vmem>>, vector<32x1xf32>
    tpu.vector_store %arg6[%c0_8, %c0_9], %14 {strides = array<i32>} : memref<32x1xf32, #tpu.memory_space<vmem>>, vector<32x1xf32>,
    %c0_10 = arith.constant 0 : index
    %c0_11 = arith.constant 0 : index
    %16 = vector.load %arg7[%c0_10, %c0_11] : memref<32x1xf32, #tpu.memory_space<vmem>>, vector<32x1xf32>
    %cst_12 = arith.constant dense<0.000000e+00> : vector<32xf32>
    %17 = vector.multi_reduction <add>, %10, %cst_12 [1] : vector<32x128xf32> to vector<32xf32>
    %18 = vector.shape_cast %17 : vector<32xf32> to vector<32x1xf32>
    %19 = arith.addf %16, %18 : vector<32x1xf32>
    %c0_13 = arith.constant 0 : index
    %c0_14 = arith.constant 0 : index
    %20 = vector.load %arg7[%c0_13, %c0_14] : memref<32x1xf32, #tpu.memory_space<vmem>>, vector<32x1xf32>
    tpu.vector_store %arg7[%c0_13, %c0_14], %19 {strides = array<i32>} : memref<32x1xf32, #tpu.memory_space<vmem>>, vector<32x1xf32>,
    %c3_i32 = arith.constant 3 : i32
    %21 = arith.cmpi eq, %arg1, %c3_i32 : i32
    %22 = arith.extui %21 : i1 to i32
    %c0_i32_15 = arith.constant 0 : i32
    %23 = arith.cmpi ne, %22, %c0_i32_15 : i32
    scf.if %23 {
      %c0_16 = arith.constant 0 : index
      %c0_17 = arith.constant 0 : index
      %24 = vector.load %arg6[%c0_16, %c0_17] : memref<32x1xf32, #tpu.memory_space<vmem>>, vector<32x1xf32>
      %c0_18 = arith.constant 0 : index
      %c0_19 = arith.constant 0 : index
      %25 = vector.load %arg7[%c0_18, %c0_19] : memref<32x1xf32, #tpu.memory_space<vmem>>, vector<32x1xf32>
      %cst_20 = arith.constant 0.000000e+00 : f32
      %26 = vector.broadcast %cst_20 : f32 to vector<32x1xf32>
      %27 = arith.cmpf one, %24, %26 : vector<32x1xf32>
      %cst_21 = arith.constant 0.000000e+00 : f32
      %28 = vector.broadcast %cst_21 : f32 to vector<32x1xf32>
      %29 = arith.cmpf one, %25, %28 : vector<32x1xf32>
      %30 = arith.andi %27, %29 : vector<32x1xi1>
      %cst_22 = arith.constant 0.000000e+00 : f32
      %31 = vector.broadcast %cst_22 : f32 to vector<32x1xf32>
      %32 = arith.cmpf one, %24, %31 : vector<32x1xf32>
      %cst_23 = arith.constant 1.000000e+00 : f32
      %33 = vector.broadcast %cst_23 : f32 to vector<32x1xf32>
      %34 = arith.select %32, %24, %33 : vector<32x1xi1>, vector<32x1xf32>
      %35 = arith.divf %25, %34 : vector<32x1xf32>
      %cst_24 = arith.constant 1.000000e+00 : f32
      %36 = vector.broadcast %cst_24 : f32 to vector<32x1xf32>
      %37 = arith.select %30, %35, %36 : vector<32x1xi1>, vector<32x1xf32>
      %38 = math.log %37 : vector<32x1xf32>
      %cst_25 = arith.constant 0.000000e+00 : f32
      %39 = vector.broadcast %cst_25 : f32 to vector<32x1xf32>
      %40 = arith.addf %39, %38 : vector<32x1xf32>
      %c0_26 = arith.constant 0 : index
      %41 = memref.load %arg2[%c0_26] : memref<1xi32, #tpu.memory_space<smem>>
      %c80_i32 = arith.constant 80 : i32
      %42 = arith.cmpi slt, %41, %c80_i32 : i32
      %cst_27 = arith.constant -1.000000e+00 : f32
      %43 = vector.broadcast %cst_27 : f32 to vector<32x1xf32>
      %44 = arith.select %42, %40, %43 : vector<32x1xf32>
      %45 = arith.mulf %44, %40 : vector<32x1xf32>
      %cst_28 = arith.constant 0.000000e+00 : f32
      %46 = vector.broadcast %cst_28 : f32 to vector<32x1xf32>
      %47 = arith.select %30, %45, %46 : vector<32x1xi1>, vector<32x1xf32>
      %c0_29 = arith.constant 0 : index
      %c0_30 = arith.constant 0 : index
      %48 = vector.load %arg5[%c0_29, %c0_30] : memref<32x1xf32, #tpu.memory_space<vmem>>, vector<32x1xf32>
      tpu.vector_store %arg5[%c0_29, %c0_30], %47 {strides = array<i32>} : memref<32x1xf32, #tpu.memory_space<vmem>>, vector<32x1xf32>,
    } else {
    }
    return
  }
  func.func @transform_0(%arg0: i32, %arg1: i32, %arg2: memref<1xi32, #tpu.memory_space<smem>>) -> (i32, i32) {
    %c0_i32 = arith.constant 0 : i32
    return %arg0, %arg1 : i32, i32
  }
  func.func @transform_1(%arg0: i32, %arg1: i32, %arg2: memref<1xi32, #tpu.memory_space<smem>>) -> (i32, i32) {
    %c0_i32 = arith.constant 0 : i32
    return %arg0, %arg1 : i32, i32
  }
  func.func @transform_2(%arg0: i32, %arg1: i32, %arg2: memref<1xi32, #tpu.memory_space<smem>>) -> (i32, i32) {
    %c0_i32 = arith.constant 0 : i32
    %c0_i32_0 = arith.constant 0 : i32
    return %arg0, %c0_i32 : i32, i32
  }
}

</mosaic_0001>

<bundles_post_ra>
// kernel: tpu_custom_call.1
= control target key start
LH: loop header
LB: loop body
LE: loop exit
PB: predicated region body
PF: predicated region fallthrough
CT: control target
= control target key end

     0   :  { %s922_s0 = inlined_call_operand.<no memory space> [shape: s32[1], index: 0, kind: input, shape index: {}]   ;;  %s923_s1 = inlined_call_operand.hbm [shape: bf16[32,512], index: 1, kind: input, shape index: {}]   ;;  %s924_s2 = inlined_call_operand.hbm [shape: s8[32,512], index: 2, kind: input, shape index: {}]   ;;  %s925_s3 = inlined_call_operand.vmem [shape: f32[32,1], index: 3, kind: output, shape index: {}]  }
   0x1   :  { %8 = sst [smem:[#allocation5]] %s922_s0 }
   0x2   :  { %9 = vsyncpa [#allocation7], 0 }
   0x3   :  { %11 = vsyncpa [#allocation7 + $0x1], 0 }
   0x4   :  { %12 = vsyncpa [#allocation9], 0 }
   0x5   :  { %14 = vsyncpa [#allocation9 + $0x1], 0  ;;  %s723_s14 = smov 0   ;;  %s725_s15 = smov 0  }
   0x6   :  { %s727_s16 = smov 0   ;;  %s729_s17 = smov 0  }
   0x7   :  { %s731_s18 = smov 0   ;;  %s733_s19 = smov 0  }
   0x8 LB: > { %s477_s0 = sadd.s32 4294967295, %s692_s19   ;;  %s29_s20 = sadd.s32 1, %s688_s18  ;;  %s692_s19 = sphi %s733_s19, %s20_s19   ;;  %s688_s18 = sphi %s731_s18, %s944_s18   ;;  %s684_s17 = sphi %s729_s17, %s943_s17   ;;  %s680_s16 = sphi %s727_s16, %s942_s16   ;;  %s676_s15 = sphi %s725_s15, %s941_s15   ;;  %s672_s14 = sphi %s723_s14, %s940_s14  }
   0x9   : > { %p30_p0 = scmp.ge.s32.totalorder %s29_s20, 4  ;;  %s41_s21 = sadd.s32 1, %s680_s16 }
   0xa   : > { %p48_p1 = scmp.ne.s32.totalorder %s680_s16, %s676_s15  ;;  %p49_p2 = scmp.eq.s32.totalorder %s692_s19, 0 }
   0xb   : > { %s946_s20 = smov (%p30_p0, %s29_s20), 0  ;;  %p54_p4 = scmp.ne.s32.totalorder %s676_s15, %s672_s14 }
   0xc   : > { %p759_p3 = por %p49_p2, %p48_p1  ;;  %s37_s23 = ssub.s32 %s688_s18, %s946_s20 }
   0xd   : > { %p55_p5 = scmp.eq.s32.totalorder %s477_s0, 0  ;;  %p39_p6 = scmp.eq.s32.totalorder %s37_s23, 0 }
   0xe   : > { %p513_p8 = scmp.lt.s32.totalorder %s692_s19, 4  ;;  %s775_s26 = sand.u32 1, %s680_s16  }
   0xf   : > { %p766_p7 = por %p55_p5, %p54_p4  ;;  %s481_s27 = sshll.u32 %s688_s18, 6 }
  0x10   : > { %s772_s25 = scalar_select %p39_p6, %s680_s16, %s41_s21  }
  0x11   : > { %s480_s28 = sshll.u32 %s775_s26, 4  ;;  %s144_s4 = scalar_lea.hbm %s923_s1, %s481_s27 }
  0x12   : > { %s136_s5 = scalar_lea.vmem [#allocation6], %s480_s28  ;;  %p784_p9 = pnand %p513_p8, %p759_p3 }
  0x13   : > { %s145_s6 = sshll.u32 %s136_s5, 4  ;;  %p484_p10 = scmp.ge.s32.totalorder %s692_s19, 1  ;;  %s146_s6 = int_to_ptr.vmem [resolvable:$true] %s145_s6 }
  0x14   : > { %s133_s8 = scalar_lea.sflag [#allocation7], %s775_s26  ;;  %p584_p11 = pneg %p784_p9 }
  0x15   : > { %s595_s9 = scalar_lea.vmem %s146_s6, 256  ;;  %s694_s10 = smov [#allocation6]  }
  0x16   : > { %p596_p12 = scmp.ne.s32.totalorder %s146_s6, %s595_s9  ;;  %s600_s11 = sshll.u32 %s694_s10, 4  ;;  %s601_s11 = int_to_ptr.vmem [resolvable:$false] %s600_s11 }
  0x17   : > { %s602_s12 = scalar_lea.vmem %s601_s11, 512  ;;  %p603_p1 = scmp.lt.s32.totalorder %s146_s6, %s601_s11 }
  0x18   : > { %p598_p13 = pnand %p596_p12, %p584_p11  ;;  %p604_p2 = scmp.lt.s32.totalorder %s602_s12, %s595_s9 }
  0x1a   : > { %p599_p0 = pneg %p598_p13  ;;  %p605_p3 = por %p604_p2, %p603_p1 }
  0x1c   : > { %p606_p4 = pnand %p605_p3, %p599_p0 }
  0x1e   : > { %609 = shalt.err (!%p606_p4)
}
  0x1f   : > { %s695_s13 = smov 256   ;;  %s696_s14 = smov 64  }
  0x20   : > { %s697_s0 = smov 4   ;;  %p173_p5 = scmp.lt.s32.totalorder %s692_s19, 5 }
  0x21   : > { %509 = dma.hbm_to_vmem [thread:$0]  (!%p784_p9), %s144_s4, 256, %s146_s6, %s133_s8, %s695_s13, %s696_s14, %s697_s0  }
  0x22   : > { %s482_s21 = sshll.u32 %s775_s26, 3  ;;  %s483_s22 = sshll.u32 %s688_s18, 7 }
  0x23   : > { %p802_p6 = pnand %p484_p10, %p173_p5  ;;  %s166_s29 = scalar_lea.hbm %s924_s2, %s483_s22 }
  0x24   : > { %s159_s30 = scalar_lea.vmem [#allocation8], %s482_s21  ;;  %s156_s9 = scalar_lea.sflag [#allocation9], %s775_s26 }
  0x25   : > { %s168_s5 = sshll.u32 %s159_s30, 4  ;;  %s698_s4 = smov [#allocation8]   ;;  %s169_s5 = int_to_ptr.vmem [resolvable:$true] %s168_s5 }
  0x26   : > { %s623_s10 = scalar_lea.vmem %s169_s5, 128  ;;  %s628_s6 = sshll.u32 %s698_s4, 4  ;;  %s629_s6 = int_to_ptr.vmem [resolvable:$false] %s628_s6 }
  0x27   : > { %p624_p8 = scmp.ne.s32.totalorder %s169_s5, %s623_s10  ;;  %s630_s8 = scalar_lea.vmem %s629_s6, 256 }
  0x28   : > { %p631_p10 = scmp.lt.s32.totalorder %s169_s5, %s629_s6  ;;  %p632_p0 = scmp.lt.s32.totalorder %s630_s8, %s623_s10 }
  0x29   : > { %p626_p12 = pnand %p624_p8, %p584_p11 }
  0x2a   : > { %p633_p1 = por %p632_p0, %p631_p10 }
  0x2b   : > { %p627_p13 = pneg %p626_p12 }
  0x2d   : > { %p634_p2 = pnand %p633_p1, %p627_p13 }
  0x2f   : > { %637 = shalt.err (!%p634_p2)
}
  0x30   : > { %512 = dma.hbm_to_vmem [thread:$0]  (!%p784_p9), %s166_s29, 128, %s169_s5, %s156_s9  }
  0x31   : > { %177 = sbr.rel (%p802_p6) target bundleno = 270 (0x10e), region = 28  ;;  %s179_s26 = sand.u32 (!%p802_p6), 1, %s676_s15  }
  0x32   : > { %s485_s11 = sshll.u32 (!%p802_p6), %s179_s26, 4  ;;  %s180_s12 = scalar_lea.sflag (!%p802_p6), [#allocation7], %s179_s26 }
  0x33   : > { %s183_s13 = scalar_lea.vmem (!%p802_p6), [#allocation6], %s485_s11 }
  0x36   : > { %663 = dma.done.wait (%p766_p7), %s180_s12, 256  }
  0x37   : > { %665 = vsyncadd (%p766_p7), %s180_s12, 4294967040  ;;  %s486_s14 = sshll.u32 %s179_s26, 3  ;;  %s189_s0 = scalar_lea.sflag [#allocation9], %s179_s26 }
  0x38   : > { %s192_s21 = scalar_lea.vmem [#allocation8], %s486_s14 }
  0x39   : > { %667 = dma.done.wait (%p766_p7), %s189_s0, 128  }
  0x3a   : > { %669 = vsyncadd (%p766_p7), %s189_s0, 4294967168  ;;  %p487_p9 = scmp.ne.s32.totalorder %s684_s17, 0 }
  0x3c   : > { %228 = sbr.rel (%p487_p9) target bundleno = 70 (0x46), region = 40 }
  0x41   : > { %vm229_vm0 = vcmask 7168   ;;  %v699_v0 = vmov 0.0  }
  0x42   : > { %230 = vst.msk [vmem:[#allocation2] sm:$0xff] %vm229_vm0, %v699_v0  ;;  %231 = vst.msk [vmem:[#allocation2 + $0x8] sm:$0xff] %vm229_vm0, %v699_v0 }
  0x43   : > { %232 = vst.msk [vmem:[#allocation2 + $0x10] sm:$0xff] %vm229_vm0, %v699_v0  ;;  %233 = vst.msk [vmem:[#allocation2 + $0x18] sm:$0xff] %vm229_vm0, %v699_v0 }
  0x44   : > { %234 = vst.msk [vmem:[#allocation3] sm:$0xff] %vm229_vm0, %v699_v0  ;;  %235 = vst.msk [vmem:[#allocation3 + $0x8] sm:$0xff] %vm229_vm0, %v699_v0 }
  0x45   : > { %236 = vst.msk [vmem:[#allocation3 + $0x10] sm:$0xff] %vm229_vm0, %v699_v0  ;;  %237 = vst.msk [vmem:[#allocation3 + $0x18] sm:$0xff] %vm229_vm0, %v699_v0 }
  0x46 PF: > { %v501_v1 = vld [vmem:[%s183_s13 + $0x8] sm:$0xff]   ;;  %v494_v2 = vld [vmem:[%s183_s13] sm:$0xff]   ;;  %vm279_vm5 = vcmask 7168   ;;  %p488_p7 = scmp.ne.s32.totalorder %s684_s17, 3 }
  0x47   : > { %v246_v3 = vld [vmem:[%s192_s21] sm:$0xff]  ;;  %v499_v4 = vunpack.c.l.bf16 %v501_v1  ;;  %v495_v5 = vunpack.c.l.bf16 %v494_v2  ;;  %v500_v10 = vunpack.c.h.bf16 %v501_v1  ;;  %v496_v11 = vunpack.c.h.bf16 %v494_v2  ;;  %s356_s17 = sld [smem:[#allocation5]] (!%p488_p7) }
  0x48   : > { %v248_v6 = vunpack.c.1.s8 %v246_v3  ;;  %v247_v7 = vunpack.c.0.s8 %v246_v3  ;;  %v250_v8 = vunpack.c.3.s8 %v246_v3  ;;  %v249_v9 = vunpack.c.2.s8 %v246_v3 }
  0x49   : > { %271 = vadd.xlane.f32.xlu1 %v499_v4  ;;  %267 = vadd.xlane.f32.xlu0 %v495_v5  ;;  %v263_v21 = vld [vmem:[#allocation2] sm:$0xff]  ;;  %v264_v27 = vld [vmem:[#allocation2 + $0x8] sm:$0xff] }
  0x4a   : > { %v252_v12 = vcvt.s32.f32 %v248_v6  ;;  %v251_v13 = vcvt.s32.f32 %v247_v7  ;;  %v254_v14 = vcvt.s32.f32 %v250_v8  ;;  %v253_v15 = vcvt.s32.f32 %v249_v9  ;;  %v265_v20 = vld [vmem:[#allocation2 + $0x10] sm:$0xff]  ;;  %v266_v26 = vld [vmem:[#allocation2 + $0x18] sm:$0xff] }
  0x4b   : > { %v285_v32 = vld [vmem:[#allocation3 + $0x8] sm:$0xff]  ;;  %v284_v33 = vld [vmem:[#allocation3] sm:$0xff] }
  0x4c   : > { %vm256_vm1 = vcmp.eq.f32.partialorder %v252_v12, 1.0  ;;  %vm255_vm2 = vcmp.eq.f32.partialorder %v251_v13, 1.0  ;;  %vm258_vm3 = vcmp.eq.f32.partialorder %v254_v14, 1.0  ;;  %vm257_vm4 = vcmp.eq.f32.partialorder %v253_v15, 1.0  ;;  %v287_v38 = vld [vmem:[#allocation3 + $0x18] sm:$0xff]  ;;  %v286_v39 = vld [vmem:[#allocation3 + $0x10] sm:$0xff] }
  0x4d   : > { %273 = vadd.xlane.f32.xlu1 %v500_v10  ;;  %269 = vadd.xlane.f32.xlu0 %v496_v11  ;;  %v260_v16 = vsel %vm256_vm1, %v496_v11, 0.0  ;;  %v259_v17 = vsel %vm255_vm2, %v495_v5, 0.0  ;;  %v262_v18 = vsel %vm258_vm3, %v500_v10, 0.0  ;;  %v261_v19 = vsel %vm257_vm4, %v499_v4, 0.0  ;;  %p357_p11 = scmp.lt.s32.totalorder (!%p488_p7), %s356_s17, 80 }
  0x51   : > { %290 = vadd.xlane.f32.xlu1 %v260_v16  ;;  %288 = vadd.xlane.f32.xlu0 %v259_v17 }
  0x55   : > { %294 = vadd.xlane.f32.xlu1 %v262_v18  ;;  %292 = vadd.xlane.f32.xlu0 %v261_v19 }
  0xd2   : > { %v272_v22 = vpop.xlane.xlu1 %271  ;;  %v268_v23 = vpop.xlane.xlu0 %267 }
  0xd3   : > { %v277_v24 = vadd.f32 %v272_v22, %v265_v20  ;;  %v275_v25 = vadd.f32 %v268_v23, %v263_v21 }
  0xd5   : > { %282 = vst.msk [vmem:[#allocation2 + $0x10] sm:$0xff] %vm279_vm5, %v277_v24  ;;  %280 = vst.msk [vmem:[#allocation2] sm:$0xff] %vm279_vm5, %v275_v25 }
  0xd6   : > { %v274_v28 = vpop.xlane.xlu1 %273  ;;  %v270_v29 = vpop.xlane.xlu0 %269 }
  0xd7   : > { %v278_v30 = vadd.f32 %v274_v28, %v266_v26  ;;  %v276_v31 = vadd.f32 %v270_v29, %v264_v27 }
  0xd9   : > { %283 = vst.msk [vmem:[#allocation2 + $0x18] sm:$0xff] %vm279_vm5, %v278_v30  ;;  %281 = vst.msk [vmem:[#allocation2 + $0x8] sm:$0xff] %vm279_vm5, %v276_v31 }
  0xda   : > { %v291_v34 = vpop.xlane.xlu1 %290  ;;  %v289_v35 = vpop.xlane.xlu0 %288 }
  0xdb   : > { %v297_v36 = vadd.f32 %v291_v34, %v285_v32  ;;  %v296_v37 = vadd.f32 %v289_v35, %v284_v33 }
  0xdd   : > { %301 = vst.msk [vmem:[#allocation3 + $0x8] sm:$0xff] %vm279_vm5, %v297_v36  ;;  %300 = vst.msk [vmem:[#allocation3] sm:$0xff] %vm279_vm5, %v296_v37  ;;  %307 = sbr.rel (%p488_p7) target bundleno = 270 (0x10e), region = 44 }
  0xde   : > { %v295_v40 = vpop.xlane.xlu1 %294  ;;  %v293_v41 = vpop.xlane.xlu0 %292 }
  0xdf   : > { %v299_v42 = vadd.f32 %v295_v40, %v287_v38  ;;  %v298_v43 = vadd.f32 %v293_v41, %v286_v39 }
  0xe1   : > { %303 = vst.msk [vmem:[#allocation3 + $0x18] sm:$0xff] %vm279_vm5, %v299_v42  ;;  %302 = vst.msk [vmem:[#allocation3 + $0x10] sm:$0xff] %vm279_vm5, %v298_v43 }
  0xe2   : > { %v308_v44 = vld [vmem:[#allocation2] sm:$0xff]  ;;  %v309_v45 = vld [vmem:[#allocation2 + $0x8] sm:$0xff]  ;;  %v310_v46 = vld [vmem:[#allocation2 + $0x10] sm:$0xff]  ;;  %s358_s24 = scalar_select %p357_p11, 1, 0 }
  0xe3   : > { %vm316_vm6 = vcmp.ne.f32.partialorder %v308_v44, 0.0  ;;  %vm317_vm7 = vcmp.ne.f32.partialorder %v309_v45, 0.0  ;;  %vm318_vm8 = vcmp.ne.f32.partialorder %v310_v46, 0.0  ;;  %v311_v49 = vld [vmem:[#allocation2 + $0x18] sm:$0xff] }
  0xe4   : > { %v328_v47 = vsel %vm316_vm6, %v308_v44, 1.0  ;;  %v329_v48 = vsel %vm317_vm7, %v309_v45, 1.0  ;;  %v330_v50 = vsel %vm318_vm8, %v310_v46, 1.0  ;;  %vm319_vm9 = vcmp.ne.f32.partialorder %v311_v49, 0.0  ;;  %v312_v52 = vld [vmem:[#allocation3] sm:$0xff]  ;;  %v313_v53 = vld [vmem:[#allocation3 + $0x8] sm:$0xff] }
  0xe5   : > { %566 = vrcp.f32 %v328_v47  ;;  %v331_v51 = vsel %vm319_vm9, %v311_v49, 1.0  ;;  %vm320_vm10 = vcmp.ne.f32.partialorder %v312_v52, 0.0  ;;  %vm321_vm11 = vcmp.ne.f32.partialorder %v313_v53, 0.0 }
  0xe6   : > { %568 = vrcp.f32 %v329_v48  ;;  %vm841_vm13 = vmand %vm316_vm6, %vm320_vm10  ;;  %v359_v8 = vstv %s358_s24 }
  0xe7   : > { %570 = vrcp.f32 %v330_v50  ;;  %vm846_vm15 = vmand %vm317_vm7, %vm321_vm11  ;;  %vm868_vm2 = vcmp.eq.s32.totalorder %v359_v8, 1 }
  0xe8   : > { %572 = vrcp.f32 %v331_v51  ;;  %v314_v54 = vld [vmem:[#allocation3 + $0x10] sm:$0xff]  ;;  %v315_v55 = vld [vmem:[#allocation3 + $0x18] sm:$0xff] }
  0xe9   : > { %vm322_vm12 = vcmp.ne.f32.partialorder %v314_v54, 0.0  ;;  %vm323_vm14 = vcmp.ne.f32.partialorder %v315_v55, 0.0 }
  0xea   : > { %vm851_vm0 = vmand %vm318_vm8, %vm322_vm12 }
  0xeb   : > { %vm858_vm1 = vmand %vm319_vm9, %vm323_vm14 }
  0xf2   : > { %v567_v56 = vpop.eup %566 }
  0xf3   : > { %v569_v58 = vpop.eup %568  ;;  %v333_v59 = vmul.f32 %v567_v56, %v312_v52 }
  0xf4   : > { %v571_v61 = vpop.eup %570  ;;  %v335_v62 = vmul.f32 %v569_v58, %v313_v53 }
  0xf5   : > { %v573_v0 = vpop.eup %572  ;;  %v340_v1 = vsel %vm841_vm13, %v333_v59, 1.0  ;;  %v337_v2 = vmul.f32 %v571_v61, %v314_v54 }
  0xf6   : > { %574 = vlog2.f32 %v340_v1  ;;  %v341_v4 = vsel %vm846_vm15, %v335_v62, 1.0  ;;  %v339_v5 = vmul.f32 %v573_v0, %v315_v55 }
  0xf7   : > { %576 = vlog2.f32 %v341_v4  ;;  %v342_v6 = vsel %vm851_vm0, %v337_v2, 1.0 }
  0xf8   : > { %578 = vlog2.f32 %v342_v6  ;;  %v343_v7 = vsel %vm858_vm1, %v339_v5, 1.0 }
  0xf9   : > { %580 = vlog2.f32 %v343_v7 }
 0x103   : > { %v575_v9 = vpop.eup %574 }
 0x104   : > { %v577_v11 = vpop.eup %576  ;;  %v345_v12 = vmul.f32 0.6931472, %v575_v9 }
 0x105   : > { %v579_v13 = vpop.eup %578  ;;  %v347_v14 = vmul.f32 0.6931472, %v577_v11 }
 0x106   : > { %v581_v15 = vpop.eup %580  ;;  %v361_v16 = vsel %vm868_vm2, %v345_v12, -1.0  ;;  %v349_v17 = vmul.f32 0.6931472, %v579_v13 }
 0x107   : > { %v365_v18 = vmul.f32 %v361_v16, %v345_v12  ;;  %v362_v19 = vsel %vm868_vm2, %v347_v14, -1.0  ;;  %v351_v20 = vmul.f32 0.6931472, %v581_v15 }
 0x108   : > { %v366_v21 = vmul.f32 %v362_v19, %v347_v14  ;;  %v363_v22 = vsel %vm868_vm2, %v349_v17, -1.0 }
 0x109   : > { %v369_v23 = vsel %vm841_vm13, %v365_v18, 0.0  ;;  %v367_v24 = vmul.f32 %v363_v22, %v349_v17  ;;  %v364_v25 = vsel %vm868_vm2, %v351_v20, -1.0 }
 0x10a   : > { %373 = vst.msk [vmem:[%s925_s3] sm:$0xff] %vm279_vm5, %v369_v23  ;;  %v370_v26 = vsel %vm846_vm15, %v366_v21, 0.0  ;;  %v368_v27 = vmul.f32 %v364_v25, %v351_v20 }
 0x10b   : > { %374 = vst.msk [vmem:[%s925_s3 + $0x8] sm:$0xff] %vm279_vm5, %v370_v26  ;;  %v371_v28 = vsel %vm851_vm0, %v367_v24, 0.0 }
 0x10c   : > { %375 = vst.msk [vmem:[%s925_s3 + $0x10] sm:$0xff] %vm279_vm5, %v371_v28  ;;  %v372_v29 = vsel %vm858_vm1, %v368_v27, 0.0 }
 0x10d   : > { %376 = vst.msk [vmem:[%s925_s3 + $0x18] sm:$0xff] %vm279_vm5, %v372_v29 }
 0x10e PF: > { %s20_s19 = sadd.s32 1, %s692_s19   ;;  %s940_s14 = smov %s676_s15 }
 0x10f   : > { %p17_p3 = scmp.ge.s32.totalorder %s20_s19, 6   ;;  %s941_s15 = smov %s680_s16 }
 0x110   : > { %s942_s16 = smov %s772_s25  ;;  %s943_s17 = smov %s688_s18 }
 0x111   : > { %s944_s18 = smov %s946_s20  ;;  %19 = sbr.rel (!%p17_p3) target bundleno = 8 (0x8), region = 89 }
 0x116   :  { %399 = vsyncpa [#allocation7], 1 }
 0x117   :  { %401 = vsyncpa [#allocation7 + $0x1], 1 }
 0x118   :  { %402 = vsyncpa [#allocation9], 1 }
 0x119   :  { %404 = vsyncpa [#allocation9 + $0x1], 1 }

</bundles_post_ra>
